<compile_context>
chip_gen: v6e
topology: v6e:2x2x1
jax: 0.10.0
libtpu: 0.0.40
codegen_flags: <defaults>
</compile_context>

<pallas_src>
import jax
import jax.numpy as jnp
from jax.experimental import pallas as pl
from jax.experimental.pallas import tpu as pltpu

EPS = 1e-5  # torch.nn.BatchNorm3d default eps


# --------------------------------------------------------------------------
# Pallas kernel: fused deconv(2,2) + folded-BN + ReLU + maxpool(2,2)
# --------------------------------------------------------------------------
def zoomconv_kernel(xT_ref, w_ref, shift_ref, o_ref):
    # xT_ref:    (C_in_pad, M_blk)          channel-major activations (lane-dense)
    # w_ref:     (KVOL*C_out, C_in_pad)     BN-scale-folded deconv weights,
    #                                       rows ordered k*C_out + co
    # shift_ref: (C_out, 1)                 folded BN/bias shift per channel
    # o_ref:     (C_out, M_blk)             pooled output (lane-dense)
    c_out = o_ref.shape[0]
    kvol = w_ref.shape[0] // c_out

    # one fused matmul for all 8 kernel taps and all output channels
    y = jnp.dot(w_ref[...], xT_ref[...],
                preferred_element_type=jnp.float32)      # (KVOL*C_out, M_blk)

    # max-pool over the 8 kernel taps = max over 8 sublane-aligned row groups
    acc = y[0:c_out, :]
    for k in range(1, kvol):
        acc = jnp.maximum(acc, y[k * c_out:(k + 1) * c_out, :])

    # shift + ReLU applied once on the reduced slab (valid: shift is constant
    # across taps and ReLU is monotone, so they commute with the max)
    o_ref[...] = jnp.maximum(acc + shift_ref[...], 0.0)


# --------------------------------------------------------------------------
# wrapper: layout plumbing + BN folding, single pallas_call
# --------------------------------------------------------------------------
@jax.jit
def zoom_conv_forward(x, weight, bias, gamma, beta, running_mean, running_var):
    """x: (N, C_in, D, H, W); weight: (C_in, C_out, 2, 2, 2)  [torch layout]."""
    N, C_in, D, H, W = x.shape
    C_out = weight.shape[1]
    kvol = weight.shape[2] * weight.shape[3] * weight.shape[4]   # 8
    M = N * D * H * W

    # ---- fold eval-mode BN + deconv bias into (scale, shift) -------------
    inv_std = jax.lax.rsqrt(running_var + EPS)
    scale = gamma * inv_std                         # (C_out,)
    shift = beta + (bias - running_mean) * scale    # (C_out,)

    # ---- fold scale into the weights; rows ordered k*C_out + co ----------
    w_scaled = weight * scale[None, :, None, None, None]
    w_rows = jnp.transpose(w_scaled, (2, 3, 4, 1, 0)).reshape(kvol * C_out, C_in)

    # pad contraction dim to a full sublane tile (8) with zeros (exact)
    C_pad = ((C_in + 7) // 8) * 8
    w_rows = jnp.pad(w_rows, ((0, 0), (0, C_pad - C_in)))

    # ---- channel-major, lane-dense activation slab ------------------------
    xT = jnp.transpose(x, (1, 0, 2, 3, 4)).reshape(C_in, M)
    xT = jnp.pad(xT, ((0, C_pad - C_in), (0, 0)))

    shift_col = shift.reshape(C_out, 1)

    # split M across 2 grid steps when cleanly possible (v7x: one per TC)
    m_blk = M // 2 if (M % 256 == 0) else M
    grid = (M // m_blk,)

    out_T = pl.pallas_call(
        zoomconv_kernel,
        out_shape=jax.ShapeDtypeStruct((C_out, M), jnp.float32),
        grid=grid,
        in_specs=[
            pl.BlockSpec((C_pad, m_blk), lambda i: (0, i)),
            pl.BlockSpec((kvol * C_out, C_pad), lambda i: (0, 0)),
            pl.BlockSpec((C_out, 1), lambda i: (0, 0)),
        ],
        out_specs=pl.BlockSpec((C_out, m_blk), lambda i: (0, i)),
        compiler_params=pltpu.CompilerParams(
            dimension_semantics=("parallel",)),
    )(xT, w_rows, shift_col)

    # back to torch layout (N, C_out, D, H, W)
    return out_T.reshape(C_out, N, D, H, W).transpose(1, 0, 2, 3, 4)


# --------------------------------------------------------------------------
# pure-JAX reference: literal deconv -> BN(eval) -> ReLU -> maxpool
# --------------------------------------------------------------------------
@jax.jit
def zoom_conv_reference(x, weight, bias, gamma, beta, running_mean, running_var):
    N, C_in, D, H, W = x.shape
    C_out = weight.shape[1]
    # ConvTranspose3d, k=2, s=2: each input voxel produces a 2x2x2 block
    up = jnp.einsum('nidhw,ioabc->nodahbwc', x, weight)
    up = up.reshape(N, C_out, 2 * D, 2 * H, 2 * W)
    up = up + bias[None, :, None, None, None]
    # BatchNorm3d (eval)
    sc = (gamma * jax.lax.rsqrt(running_var + EPS))[None, :, None, None, None]
    y = (up - running_mean[None, :, None, None, None]) * sc \
        + beta[None, :, None, None, None]
    # ReLU
    y = jnp.maximum(y, 0.0)
    # MaxPool3d, k=2, s=2
    y = y.reshape(N, C_out, D, 2, H, 2, W, 2).max(axis=(3, 5, 7))
    return y


# --------------------------------------------------------------------------
if __name__ == "__main__":
    key = jax.random.PRNGKey(0)
    ks = jax.random.split(key, 7)

    N, C_IN, C_OUT = 2, 4, 16
    D = H = W = 8

    x = jax.random.normal(ks[0], (N, C_IN, D, H, W), dtype=jnp.float32)
    weight = 0.1 * jax.random.normal(ks[1], (C_IN, C_OUT, 2, 2, 2),
                                     dtype=jnp.float32)
    bias = 0.05 * jax.random.normal(ks[2], (C_OUT,), dtype=jnp.float32)
    gamma = 1.0 + 0.1 * jax.random.normal(ks[3], (C_OUT,), dtype=jnp.float32)
    gamma = gamma.at[0].set(-0.7)   # exercise negative BN scale path
    beta = 0.05 * jax.random.normal(ks[4], (C_OUT,), dtype=jnp.float32)
    running_mean = 0.05 * jax.random.normal(ks[5], (C_OUT,), dtype=jnp.float32)
    running_var = jax.random.uniform(ks[6], (C_OUT,), dtype=jnp.float32,
                                     minval=0.5, maxval=1.5)

    out = zoom_conv_forward(x, weight, bias, gamma, beta,
                            running_mean, running_var)
    out = jax.block_until_ready(out)

    ref = zoom_conv_reference(x, weight, bias, gamma, beta,
                              running_mean, running_var)

    assert out.shape == (N, C_OUT, D, H, W)
    assert jnp.allclose(out, ref, atol=1e-4, rtol=1e-4), "mismatch vs reference"

    print("KERNEL_OK")
</pallas_src>

<mosaic_0001>
module attributes {stable_mosaic.version = 11 : i64} {
  func.func @zoomconv_kernel(%arg0: i32, %arg1: memref<8x512xf32, #tpu.memory_space<vmem>>, %arg2: memref<128x8xf32, #tpu.memory_space<vmem>>, %arg3: memref<16x1xf32, #tpu.memory_space<vmem>>, %arg4: memref<16x512xf32, #tpu.memory_space<vmem>>) attributes {dimension_semantics = [#tpu.dimension_semantics<parallel>], iteration_bounds = array<i64: 2>, scalar_prefetch = 0 : i64, scratch_operands = 0 : i64, tpu.core_type = #tpu.core_type<tc>, window_params = [{transform_indices = @transform_0, window_bounds = array<i64: 8, 512>}, {pipeline_mode = #tpu.pipeline_mode<synchronous>, transform_indices = @transform_1, window_bounds = array<i64: 128, 8>}, {pipeline_mode = #tpu.pipeline_mode<synchronous>, transform_indices = @transform_2, window_bounds = array<i64: 16, 1>}, {transform_indices = @transform_3, window_bounds = array<i64: 16, 512>}]} {
    %c0 = arith.constant 0 : index
    %c0_0 = arith.constant 0 : index
    %0 = vector.load %arg2[%c0, %c0_0] : memref<128x8xf32, #tpu.memory_space<vmem>>, vector<128x8xf32>
    %c0_1 = arith.constant 0 : index
    %c0_2 = arith.constant 0 : index
    %1 = vector.load %arg1[%c0_1, %c0_2] : memref<8x512xf32, #tpu.memory_space<vmem>>, vector<8x512xf32>
    %cst = arith.constant dense<0.000000e+00> : vector<128x512xf32>
    %2 = tpu.matmul %0, %1, %cst {dimension_numbers = #tpu.dot_dimension_numbers<[1], [0], [0], [1], [0, 0, 1, 1], [], []>} : vector<128x8xf32>, vector<8x512xf32>, vector<128x512xf32> -> vector<128x512xf32>
    %3 = vector.extract_strided_slice %2 {offsets = [0, 0], sizes = [16, 512], strides = [1, 1]} : vector<128x512xf32> to vector<16x512xf32>
    %4 = vector.extract_strided_slice %2 {offsets = [16, 0], sizes = [16, 512], strides = [1, 1]} : vector<128x512xf32> to vector<16x512xf32>
    %5 = arith.maximumf %3, %4 : vector<16x512xf32>
    %6 = vector.extract_strided_slice %2 {offsets = [32, 0], sizes = [16, 512], strides = [1, 1]} : vector<128x512xf32> to vector<16x512xf32>
    %7 = arith.maximumf %5, %6 : vector<16x512xf32>
    %8 = vector.extract_strided_slice %2 {offsets = [48, 0], sizes = [16, 512], strides = [1, 1]} : vector<128x512xf32> to vector<16x512xf32>
    %9 = arith.maximumf %7, %8 : vector<16x512xf32>
    %10 = vector.extract_strided_slice %2 {offsets = [64, 0], sizes = [16, 512], strides = [1, 1]} : vector<128x512xf32> to vector<16x512xf32>
    %11 = arith.maximumf %9, %10 : vector<16x512xf32>
    %12 = vector.extract_strided_slice %2 {offsets = [80, 0], sizes = [16, 512], strides = [1, 1]} : vector<128x512xf32> to vector<16x512xf32>
    %13 = arith.maximumf %11, %12 : vector<16x512xf32>
    %14 = vector.extract_strided_slice %2 {offsets = [96, 0], sizes = [16, 512], strides = [1, 1]} : vector<128x512xf32> to vector<16x512xf32>
    %15 = arith.maximumf %13, %14 : vector<16x512xf32>
    %16 = vector.extract_strided_slice %2 {offsets = [112, 0], sizes = [16, 512], strides = [1, 1]} : vector<128x512xf32> to vector<16x512xf32>
    %17 = arith.maximumf %15, %16 : vector<16x512xf32>
    %c0_3 = arith.constant 0 : index
    %c0_4 = arith.constant 0 : index
    %18 = vector.load %arg3[%c0_3, %c0_4] : memref<16x1xf32, #tpu.memory_space<vmem>>, vector<16x1xf32>
    %19 = vector.broadcast %18 : vector<16x1xf32> to vector<16x512xf32>
    %20 = arith.addf %17, %19 : vector<16x512xf32>
    %cst_5 = arith.constant 0.000000e+00 : f32
    %21 = vector.broadcast %cst_5 : f32 to vector<16x512xf32>
    %22 = arith.maximumf %20, %21 : vector<16x512xf32>
    %c0_6 = arith.constant 0 : index
    %c0_7 = arith.constant 0 : index
    %23 = vector.load %arg4[%c0_6, %c0_7] : memref<16x512xf32, #tpu.memory_space<vmem>>, vector<16x512xf32>
    tpu.vector_store %arg4[%c0_6, %c0_7], %22 {strides = array<i32>} : memref<16x512xf32, #tpu.memory_space<vmem>>, vector<16x512xf32>,
    return
  }
  func.func @transform_0(%arg0: i32) -> (i32, i32) {
    %c0_i32 = arith.constant 0 : i32
    %c0_i32_0 = arith.constant 0 : i32
    return %c0_i32, %arg0 : i32, i32
  }
  func.func @transform_1(%arg0: i32) -> (i32, i32) {
    %c0_i32 = arith.constant 0 : i32
    %c0_i32_0 = arith.constant 0 : i32
    %c0_i32_1 = arith.constant 0 : i32
    return %c0_i32, %c0_i32_0 : i32, i32
  }
  func.func @transform_2(%arg0: i32) -> (i32, i32) {
    %c0_i32 = arith.constant 0 : i32
    %c0_i32_0 = arith.constant 0 : i32
    %c0_i32_1 = arith.constant 0 : i32
    return %c0_i32, %c0_i32_0 : i32, i32
  }
  func.func @transform_3(%arg0: i32) -> (i32, i32) {
    %c0_i32 = arith.constant 0 : i32
    %c0_i32_0 = arith.constant 0 : i32
    return %c0_i32, %arg0 : i32, i32
  }
}

</mosaic_0001>

<bundles_post_ra>
// kernel: zoom_conv_forward.1
= control target key start
LH: loop header
LB: loop body
LE: loop exit
PB: predicated region body
PF: predicated region fallthrough
CT: control target
= control target key end

     0   :  { %s861_s12 = smov 0   ;;  %s863_s13 = smov 0   ;;  %s1083_s0 = inlined_call_operand.vmem [shape: f32[8,1024], index: 0, kind: input, shape index: {}]   ;;  %s1084_s1 = inlined_call_operand.vmem [shape: f32[128,8], index: 1, kind: input, shape index: {}]   ;;  %s1085_s2 = inlined_call_operand.vmem [shape: f32[16,1], index: 2, kind: input, shape index: {}]   ;;  %s1086_s3 = inlined_call_operand.vmem [shape: f32[16,1024], index: 3, kind: output, shape index: {}]  }
   0x1   :  { %s865_s14 = smov 0  }
   0x2 LB: > { %s874_s15 = sadd.s32 4294967295, %s837_s14   ;;  %s876_s16 = sadd.s32 1, %s837_s14   ;;  %s837_s14 = sphi %s865_s14, %s1090_s14   ;;  %s833_s13 = sphi %s863_s13, %s1089_s13   ;;  %s829_s12 = sphi %s861_s12, %s1088_s12  }
   0x3   : > { %s85_s17 = ssub.s32 %s837_s14, %s876_s16  ;;  %s88_s18 = sadd.s32 1, %s833_s13 }
   0x4   : > { %p86_p0 = scmp.eq.s32.totalorder %s85_s17, 0  ;;  %p98_p1 = scmp.ne.s32.totalorder %s833_s13, %s829_s12 }
   0x5   : > { %p99_p2 = scmp.eq.s32.totalorder %s874_s15, 1  ;;  %p746_p3 = scmp.ge.s32.totalorder %s837_s14, 1 }
   0x6   : > { %s884_s19 = scalar_select %p86_p0, %s833_s13, %s88_s18  }
   0x7   : > { %p886_p4 = por %p99_p2, %p98_p1  ;;  %p138_p5 = scmp.lt.s32.totalorder %s837_s14, 3 }
   0x9   : > { %p139_p6 = pnand %p746_p3, %p138_p5 }
   0xa   : > { %s748_s21 = sshll.u32 (!%p139_p6), %s874_s15, 2  ;;  %s158_s18 = sand.u32 (!%p139_p6), 1, %s829_s12  }
   0xb   : > { %142 = sbr.rel (%p139_p6) target bundleno = 292 (0x124), region = 32  ;;  %p162_p7 = scmp.lt.s32.totalorder (!%p139_p6), %s748_s21, 7 }
  0x10   : > { %v839_v0 = vmov 0.0   ;;  %v840_v1 = vmov 0   ;;  %s1092_s21 = smov (!%p162_p7, %s748_s21), 7  ;;  %v615_v2 = vld [vmem:[%s1085_s2] sm:$0xff]  ;;  %vm188_vm0 = vcmask 64512   ;;  %v616_v8 = vld [vmem:[%s1085_s2 + $0x8] sm:$0xff] }
  0x11   : > { %301 = vmatprep.mubr.f32.mxu0 %v839_v0  ;;  %462 = vmatprep.mubr.f32.mxu1 %v839_v0  ;;  %s749_s22 = sshll.u32 %s1092_s21, 3  ;;  %v168_v3 = vld [vmem:[%s1084_s1] sm:$0xff]  ;;  %v169_v9 = vld [vmem:[%s1084_s1 + $0x8] sm:$0xff]  ;;  %v170_v10 = vld [vmem:[%s1084_s1 + $0x10] sm:$0xff]  ;;  %s747_s21 = sshll.u32 %s158_s18, 6 }
  0x12   : > { %814 = vset.pattern.permute.xlu0 %v840_v1  ;;  %s165_s27 = scalar_lea.vmem %s1083_s0, %s749_s22  ;;  %v171_v11 = vld [vmem:[%s1084_s1 + $0x18] sm:$0xff]  ;;  %v172_v12 = vld [vmem:[%s1084_s1 + $0x20] sm:$0xff]  ;;  %v173_v13 = vld [vmem:[%s1084_s1 + $0x28] sm:$0xff]  ;;  %s1049_s12 = scalar_lea.vmem [#allocation2], %s747_s21 }
  0x13   : > { %619 = vperm.xlu0 %814, %v615_v2   ;;  %v185_v4 = vld [vmem:[%s165_s27 + $0x8] sm:$0xff]  ;;  %v187_v5 = vld [vmem:[%s165_s27 + $0x18] sm:$0xff]  ;;  %v184_v6 = vld [vmem:[%s165_s27] sm:$0xff]  ;;  %s787_s22 = sshll.u32 (%p886_p4), %s874_s15, 5 }
  0x14   : > { %267 = vmatprep.subr.mxu0 %v185_v4  ;;  %428 = vmatprep.subr.mxu1 %v187_v5  ;;  %v186_v7 = vld [vmem:[%s165_s27 + $0x10] sm:$0xff]  ;;  %v175_v15 = vld [vmem:[%s1084_s1 + $0x38] sm:$0xff]  ;;  %v176_v16 = vld [vmem:[%s1084_s1 + $0x40] sm:$0xff]  ;;  %s660_s25 = scalar_lea.vmem (%p886_p4), %s1086_s3, %s787_s22 }
  0x15   : > { %268 = vmatpush1.msra.mxu0 %v184_v6  ;;  %429 = vmatpush1.msra.mxu1 %v186_v7  ;;  %v174_v14 = vld [vmem:[%s1084_s1 + $0x30] sm:$0xff]  ;;  %v177_v17 = vld [vmem:[%s1084_s1 + $0x48] sm:$0xff]  ;;  %v179_v19 = vld [vmem:[%s1084_s1 + $0x58] sm:$0xff] }
  0x16   : > { %750 = vmatmul.mubr.msk.f32.vlgmr.msra.gmra.mxu0 %vm188_vm0, %v168_v3  ;;  %766 = vmatmul.mubr.msk.f32.vlgmr.msra.gmra.mxu1 %vm188_vm0, %v168_v3  ;;  %v178_v18 = vld [vmem:[%s1084_s1 + $0x50] sm:$0xff]  ;;  %v180_v20 = vld [vmem:[%s1084_s1 + $0x60] sm:$0xff]  ;;  %v181_v21 = vld [vmem:[%s1084_s1 + $0x68] sm:$0xff] }
  0x17   : > { %307 = vmatprep.mubr.f32.mxu0 %v839_v0  ;;  %468 = vmatprep.mubr.f32.mxu1 %v839_v0  ;;  %v182_v22 = vld [vmem:[%s1084_s1 + $0x70] sm:$0xff]  ;;  %v183_v23 = vld [vmem:[%s1084_s1 + $0x78] sm:$0xff] }
  0x18   : > { %624 = vperm.xlu0 %814, %v616_v8  }
  0x1a   : > { %751 = vmatmul.mubr.msk.f32.gmra.mxu0 %vm188_vm0, %v169_v9  ;;  %767 = vmatmul.mubr.msk.f32.gmra.mxu1 %vm188_vm0, %v169_v9 }
  0x1b   : > { %313 = vmatprep.mubr.f32.mxu0 %v839_v0  ;;  %474 = vmatprep.mubr.f32.mxu1 %v839_v0 }
  0x1e   : > { %752 = vmatmul.mubr.msk.f32.gmra.mxu0 %vm188_vm0, %v170_v10  ;;  %768 = vmatmul.mubr.msk.f32.gmra.mxu1 %vm188_vm0, %v170_v10 }
  0x1f   : > { %319 = vmatprep.mubr.f32.mxu0 %v839_v0  ;;  %480 = vmatprep.mubr.f32.mxu1 %v839_v0 }
  0x22   : > { %753 = vmatmul.mubr.msk.f32.gmra.mxu0 %vm188_vm0, %v171_v11  ;;  %769 = vmatmul.mubr.msk.f32.gmra.mxu1 %vm188_vm0, %v171_v11 }
  0x23   : > { %325 = vmatprep.mubr.f32.mxu0 %v839_v0  ;;  %486 = vmatprep.mubr.f32.mxu1 %v839_v0 }
  0x26   : > { %754 = vmatmul.mubr.msk.f32.gmra.mxu0 %vm188_vm0, %v172_v12  ;;  %770 = vmatmul.mubr.msk.f32.gmra.mxu1 %vm188_vm0, %v172_v12 }
  0x27   : > { %331 = vmatprep.mubr.f32.mxu0 %v839_v0  ;;  %492 = vmatprep.mubr.f32.mxu1 %v839_v0 }
  0x2a   : > { %755 = vmatmul.mubr.msk.f32.gmra.mxu0 %vm188_vm0, %v173_v13  ;;  %771 = vmatmul.mubr.msk.f32.gmra.mxu1 %vm188_vm0, %v173_v13 }
  0x2b   : > { %337 = vmatprep.mubr.f32.mxu0 %v839_v0  ;;  %498 = vmatprep.mubr.f32.mxu1 %v839_v0 }
  0x2e   : > { %756 = vmatmul.mubr.msk.f32.gmra.mxu0 %vm188_vm0, %v174_v14  ;;  %772 = vmatmul.mubr.msk.f32.gmra.mxu1 %vm188_vm0, %v174_v14 }
  0x2f   : > { %343 = vmatprep.mubr.f32.mxu0 %v839_v0  ;;  %504 = vmatprep.mubr.f32.mxu1 %v839_v0 }
  0x32   : > { %757 = vmatmul.mubr.msk.f32.gmra.mxu0 %vm188_vm0, %v175_v15  ;;  %773 = vmatmul.mubr.msk.f32.gmra.mxu1 %vm188_vm0, %v175_v15 }
  0x33   : > { %349 = vmatprep.mubr.f32.mxu0 %v839_v0  ;;  %510 = vmatprep.mubr.f32.mxu1 %v839_v0 }
  0x36   : > { %758 = vmatmul.mubr.msk.f32.gmra.mxu0 %vm188_vm0, %v176_v16  ;;  %774 = vmatmul.mubr.msk.f32.gmra.mxu1 %vm188_vm0, %v176_v16 }
  0x37   : > { %355 = vmatprep.mubr.f32.mxu0 %v839_v0  ;;  %516 = vmatprep.mubr.f32.mxu1 %v839_v0 }
  0x3a   : > { %759 = vmatmul.mubr.msk.f32.gmra.mxu0 %vm188_vm0, %v177_v17  ;;  %775 = vmatmul.mubr.msk.f32.gmra.mxu1 %vm188_vm0, %v177_v17 }
  0x3b   : > { %361 = vmatprep.mubr.f32.mxu0 %v839_v0  ;;  %522 = vmatprep.mubr.f32.mxu1 %v839_v0 }
  0x3e   : > { %760 = vmatmul.mubr.msk.f32.gmra.mxu0 %vm188_vm0, %v178_v18  ;;  %776 = vmatmul.mubr.msk.f32.gmra.mxu1 %vm188_vm0, %v178_v18 }
  0x3f   : > { %367 = vmatprep.mubr.f32.mxu0 %v839_v0  ;;  %528 = vmatprep.mubr.f32.mxu1 %v839_v0 }
  0x42   : > { %761 = vmatmul.mubr.msk.f32.gmra.mxu0 %vm188_vm0, %v179_v19  ;;  %777 = vmatmul.mubr.msk.f32.gmra.mxu1 %vm188_vm0, %v179_v19 }
  0x43   : > { %373 = vmatprep.mubr.f32.mxu0 %v839_v0  ;;  %534 = vmatprep.mubr.f32.mxu1 %v839_v0 }
  0x46   : > { %762 = vmatmul.mubr.msk.f32.gmra.mxu0 %vm188_vm0, %v180_v20  ;;  %778 = vmatmul.mubr.msk.f32.gmra.mxu1 %vm188_vm0, %v180_v20 }
  0x47   : > { %379 = vmatprep.mubr.f32.mxu0 %v839_v0  ;;  %540 = vmatprep.mubr.f32.mxu1 %v839_v0 }
  0x4a   : > { %763 = vmatmul.mubr.msk.f32.gmra.mxu0 %vm188_vm0, %v181_v21  ;;  %779 = vmatmul.mubr.msk.f32.gmra.mxu1 %vm188_vm0, %v181_v21 }
  0x4b   : > { %385 = vmatprep.mubr.f32.mxu0 %v839_v0  ;;  %546 = vmatprep.mubr.f32.mxu1 %v839_v0 }
  0x4e   : > { %764 = vmatmul.mubr.msk.f32.gmra.mxu0 %vm188_vm0, %v182_v22  ;;  %780 = vmatmul.mubr.msk.f32.gmra.mxu1 %vm188_vm0, %v182_v22 }
  0x4f   : > { %391 = vmatprep.mubr.f32.mxu0 %v839_v0  ;;  %552 = vmatprep.mubr.f32.mxu1 %v839_v0 }
  0x52   : > { %765 = vmatmul.mubr.msk.f32.gmra.mxu0 %vm188_vm0, %v183_v23  ;;  %781 = vmatmul.mubr.msk.f32.gmra.mxu1 %vm188_vm0, %v183_v23 }
  0xd6   : > { %v303_v24 = vpop.f32.mrf.mxu0  ;;  %v464_v25 = vpop.f32.mrf.mxu1 }
  0xd8   : > { %v305_v26 = vpop.f32.mrf.mxu0  ;;  %v466_v27 = vpop.f32.mrf.mxu1 }
  0xda   : > { %v1012_v28 = vpop.f32.mrf.mxu0  ;;  %v1014_v29 = vpop.f32.mrf.mxu1 }
  0xdc   : > { %v1016_v30 = vpop.f32.mrf.mxu0  ;;  %v1018_v31 = vpop.f32.mrf.mxu1 }
  0xde   : > { %v315_v32 = vpop.f32.mrf.mxu0  ;;  %v476_v33 = vpop.f32.mrf.mxu1 }
  0xdf   : > { %v559_v6 = vmax.f32 %v303_v24, %v315_v32  ;;  %v561_v7 = vmax.f32 %v464_v25, %v476_v33 }
  0xe0   : > { %v317_v34 = vpop.f32.mrf.mxu0  ;;  %v478_v35 = vpop.f32.mrf.mxu1 }
  0xe1   : > { %v560_v10 = vmax.f32 %v305_v26, %v317_v34  ;;  %v562_v11 = vmax.f32 %v466_v27, %v478_v35 }
  0xe2   : > { %v321_v36 = vpop.f32.mrf.mxu0  ;;  %v482_v37 = vpop.f32.mrf.mxu1 }
  0xe3   : > { %v563_v20 = vmax.f32 %v1012_v28, %v321_v36  ;;  %v565_v21 = vmax.f32 %v1014_v29, %v482_v37 }
  0xe4   : > { %v323_v38 = vpop.f32.mrf.mxu0  ;;  %v484_v39 = vpop.f32.mrf.mxu1 }
  0xe5   : > { %v564_v22 = vmax.f32 %v1016_v30, %v323_v38  ;;  %v566_v23 = vmax.f32 %v1018_v31, %v484_v39 }
  0xe6   : > { %v327_v40 = vpop.f32.mrf.mxu0  ;;  %v488_v41 = vpop.f32.mrf.mxu1 }
  0xe7   : > { %v567_v12 = vmax.f32 %v559_v6, %v327_v40  ;;  %v569_v13 = vmax.f32 %v561_v7, %v488_v41 }
  0xe8   : > { %v329_v42 = vpop.f32.mrf.mxu0  ;;  %v490_v43 = vpop.f32.mrf.mxu1 }
  0xe9   : > { %v568_v16 = vmax.f32 %v560_v10, %v329_v42  ;;  %v570_v17 = vmax.f32 %v562_v11, %v490_v43 }
  0xea   : > { %v333_v44 = vpop.f32.mrf.mxu0  ;;  %v494_v45 = vpop.f32.mrf.mxu1 }
  0xeb   : > { %v571_v34 = vmax.f32 %v563_v20, %v333_v44  ;;  %v573_v35 = vmax.f32 %v565_v21, %v494_v45 }
  0xec   : > { %v335_v46 = vpop.f32.mrf.mxu0  ;;  %v496_v47 = vpop.f32.mrf.mxu1 }
  0xed   : > { %v572_v40 = vmax.f32 %v564_v22, %v335_v46  ;;  %v574_v41 = vmax.f32 %v566_v23, %v496_v47 }
  0xee   : > { %v339_v48 = vpop.f32.mrf.mxu0  ;;  %v500_v49 = vpop.f32.mrf.mxu1 }
  0xef   : > { %v575_v18 = vmax.f32 %v567_v12, %v339_v48  ;;  %v577_v19 = vmax.f32 %v569_v13, %v500_v49 }
  0xf0   : > { %v341_v50 = vpop.f32.mrf.mxu0  ;;  %v502_v51 = vpop.f32.mrf.mxu1 }
  0xf1   : > { %v576_v26 = vmax.f32 %v568_v16, %v341_v50  ;;  %v578_v27 = vmax.f32 %v570_v17, %v502_v51 }
  0xf2   : > { %v1020_v52 = vpop.f32.mrf.mxu0  ;;  %v1022_v53 = vpop.f32.mrf.mxu1 }
  0xf3   : > { %v579_v30 = vmax.f32 %v571_v34, %v1020_v52  ;;  %v581_v31 = vmax.f32 %v573_v35, %v1022_v53  ;;  %v620_v53 = vpop.permute.xlu0 %619 }
  0xf4   : > { %v1024_v54 = vpop.f32.mrf.mxu0  ;;  %v1026_v55 = vpop.f32.mrf.mxu1 }
  0xf5   : > { %v580_v38 = vmax.f32 %v572_v40, %v1024_v54  ;;  %v582_v39 = vmax.f32 %v574_v41, %v1026_v55 }
  0xf6   : > { %v351_v56 = vpop.f32.mrf.mxu0  ;;  %v512_v57 = vpop.f32.mrf.mxu1 }
  0xf7   : > { %v583_v32 = vmax.f32 %v575_v18, %v351_v56  ;;  %v585_v33 = vmax.f32 %v577_v19, %v512_v57  ;;  %v625_v23 = vpop.permute.xlu0 %624 }
  0xf8   : > { %v353_v58 = vpop.f32.mrf.mxu0  ;;  %v514_v59 = vpop.f32.mrf.mxu1 }
  0xf9   : > { %v584_v28 = vmax.f32 %v576_v26, %v353_v58  ;;  %v586_v36 = vmax.f32 %v578_v27, %v514_v59 }
  0xfa   : > { %v357_v60 = vpop.f32.mrf.mxu0  ;;  %v518_v61 = vpop.f32.mrf.mxu1 }
  0xfb   : > { %v587_v50 = vmax.f32 %v579_v30, %v357_v60  ;;  %v589_v51 = vmax.f32 %v581_v31, %v518_v61 }
  0xfc   : > { %v359_v62 = vpop.f32.mrf.mxu0  ;;  %v520_v63 = vpop.f32.mrf.mxu1 }
  0xfd   : > { %v588_v56 = vmax.f32 %v580_v38, %v359_v62  ;;  %v590_v57 = vmax.f32 %v582_v39, %v520_v63 }
  0xfe   : > { %v363_v0 = vpop.f32.mrf.mxu0  ;;  %v524_v1 = vpop.f32.mrf.mxu1 }
  0xff   : > { %v591_v29 = vmax.f32 %v583_v32, %v363_v0  ;;  %v593_v37 = vmax.f32 %v585_v33, %v524_v1 }
 0x100   : > { %v365_v2 = vpop.f32.mrf.mxu0  ;;  %v526_v3 = vpop.f32.mrf.mxu1 }
 0x101   : > { %v592_v45 = vmax.f32 %v584_v28, %v365_v2  ;;  %v594_v46 = vmax.f32 %v586_v36, %v526_v3 }
 0x102   : > { %v1028_v4 = vpop.f32.mrf.mxu0  ;;  %v1030_v5 = vpop.f32.mrf.mxu1 }
 0x103   : > { %v595_v55 = vmax.f32 %v587_v50, %v1028_v4  ;;  %v597_v6 = vmax.f32 %v589_v51, %v1030_v5 }
 0x104   : > { %v1032_v8 = vpop.f32.mrf.mxu0  ;;  %v1034_v9 = vpop.f32.mrf.mxu1 }
 0x105   : > { %v596_v2 = vmax.f32 %v588_v56, %v1032_v8  ;;  %v598_v3 = vmax.f32 %v590_v57, %v1034_v9 }
 0x106   : > { %v375_v14 = vpop.f32.mrf.mxu0  ;;  %v536_v15 = vpop.f32.mrf.mxu1 }
 0x107   : > { %v599_v47 = vmax.f32 %v591_v29, %v375_v14  ;;  %v601_v49 = vmax.f32 %v593_v37, %v536_v15 }
 0x108   : > { %v377_v24 = vpop.f32.mrf.mxu0  ;;  %v538_v25 = vpop.f32.mrf.mxu1 }
 0x109   : > { %v600_v52 = vmax.f32 %v592_v45, %v377_v24  ;;  %v602_v0 = vmax.f32 %v594_v46, %v538_v25 }
 0x10a   : > { %v381_v42 = vpop.f32.mrf.mxu0  ;;  %v542_v43 = vpop.f32.mrf.mxu1 }
 0x10b   : > { %v603_v11 = vmax.f32 %v595_v55, %v381_v42  ;;  %v605_v12 = vmax.f32 %v597_v6, %v542_v43 }
 0x10c   : > { %v383_v48 = vpop.f32.mrf.mxu0  ;;  %v544_v44 = vpop.f32.mrf.mxu1 }
 0x10d   : > { %v604_v13 = vmax.f32 %v596_v2, %v383_v48  ;;  %v606_v14 = vmax.f32 %v598_v3, %v544_v44 }
 0x10e   : > { %v387_v58 = vpop.f32.mrf.mxu0  ;;  %v548_v59 = vpop.f32.mrf.mxu1 }
 0x10f   : > { %v607_v54 = vmax.f32 %v599_v47, %v387_v58  ;;  %v609_v1 = vmax.f32 %v601_v49, %v548_v59 }
 0x110   : > { %v389_v60 = vpop.f32.mrf.mxu0  ;;  %v550_v61 = vpop.f32.mrf.mxu1 }
 0x111   : > { %v627_v62 = vadd.f32 %v620_v53, %v607_v54  ;;  %v629_v63 = vadd.f32 %v620_v53, %v609_v1  ;;  %v608_v7 = vmax.f32 %v600_v52, %v389_v60  ;;  %v610_v10 = vmax.f32 %v602_v0, %v550_v61 }
 0x112   : > { %v393_v15 = vpop.f32.mrf.mxu0  ;;  %v554_v16 = vpop.f32.mrf.mxu1 }
 0x113   : > { %v635_v17 = vmax.f32 %v627_v62, 0.0  ;;  %v637_v4 = vmax.f32 %v629_v63, 0.0  ;;  %v628_v18 = vadd.f32 %v620_v53, %v608_v7  ;;  %v630_v5 = vadd.f32 %v620_v53, %v610_v10 }
 0x114   : > { %v611_v19 = vmax.f32 %v603_v11, %v393_v15  ;;  %v613_v8 = vmax.f32 %v605_v12, %v554_v16  ;;  %v395_v20 = vpop.f32.mrf.mxu0  ;;  %v556_v9 = vpop.f32.mrf.mxu1 }
 0x115   : > { %643 = vst [vmem:[%s1049_s12] sm:$0xff] %v635_v17  ;;  %645 = vst [vmem:[%s1049_s12 + $0x10] sm:$0xff] %v637_v4  ;;  %v636_v21 = vmax.f32 %v628_v18, 0.0  ;;  %v638_v22 = vmax.f32 %v630_v5, 0.0  ;;  %v612_v24 = vmax.f32 %v604_v13, %v395_v20  ;;  %v614_v25 = vmax.f32 %v606_v14, %v556_v9 }
 0x116   : > { %v631_v26 = vadd.f32 %v625_v23, %v611_v19  ;;  %v633_v27 = vadd.f32 %v625_v23, %v613_v8 }
 0x117   : > { %644 = vst [vmem:[%s1049_s12 + $0x8] sm:$0xff] %v636_v21  ;;  %646 = vst [vmem:[%s1049_s12 + $0x18] sm:$0xff] %v638_v22  ;;  %v632_v32 = vadd.f32 %v625_v23, %v612_v24  ;;  %v634_v33 = vadd.f32 %v625_v23, %v614_v25  ;;  %657 = sbr.rel (!%p886_p4) target bundleno = 292 (0x124), region = 36 }
 0x118   : > { %v639_v34 = vmax.f32 %v631_v26, 0.0  ;;  %v641_v35 = vmax.f32 %v633_v27, 0.0 }
 0x119   : > { %v640_v40 = vmax.f32 %v632_v32, 0.0  ;;  %v642_v41 = vmax.f32 %v634_v33, 0.0 }
 0x11a   : > { %647 = vst [vmem:[%s1049_s12 + $0x20] sm:$0xff] %v639_v34  ;;  %649 = vst [vmem:[%s1049_s12 + $0x30] sm:$0xff] %v641_v35 }
 0x11b   : > { %648 = vst [vmem:[%s1049_s12 + $0x28] sm:$0xff] %v640_v40  ;;  %650 = vst [vmem:[%s1049_s12 + $0x38] sm:$0xff] %v642_v41 }
 0x11c   : > { %v673_v42 = vld [vmem:[%s1049_s12] sm:$0xff]  ;;  %v677_v28 = vld [vmem:[%s1049_s12 + $0x10] sm:$0xff] }
 0x11d   : > { %674 = vst [vmem:[%s660_s25] sm:$0xff] %v673_v42  ;;  %678 = vst [vmem:[%s660_s25 + $0x10] sm:$0xff] %v677_v28 }
 0x11e   : > { %v675_v43 = vld [vmem:[%s1049_s12 + $0x8] sm:$0xff]  ;;  %v679_v36 = vld [vmem:[%s1049_s12 + $0x18] sm:$0xff] }
 0x11f   : > { %676 = vst [vmem:[%s660_s25 + $0x8] sm:$0xff] %v675_v43  ;;  %680 = vst [vmem:[%s660_s25 + $0x18] sm:$0xff] %v679_v36 }
 0x121   : > { %v681_v29 = vld [vmem:[%s1049_s12 + $0x20] sm:$0xff]  ;;  %v685_v30 = vld [vmem:[%s1049_s12 + $0x30] sm:$0xff] }
 0x122   : > { %v683_v37 = vld [vmem:[%s1049_s12 + $0x28] sm:$0xff]  ;;  %682 = vst [vmem:[%s660_s25 + $0x40] sm:$0xff] %v681_v29  ;;  %v687_v31 = vld [vmem:[%s1049_s12 + $0x38] sm:$0xff]  ;;  %686 = vst [vmem:[%s660_s25 + $0x50] sm:$0xff] %v685_v30 }
 0x123   : > { %684 = vst [vmem:[%s660_s25 + $0x48] sm:$0xff] %v683_v37  ;;  %688 = vst [vmem:[%s660_s25 + $0x58] sm:$0xff] %v687_v31 }
 0x124 PF: > { %p10_p8 = scmp.ge.s32.totalorder %s876_s16, 4   ;;  %s1088_s12 = smov %s833_s13 }
 0x125   : > { %s1089_s13 = smov %s884_s19  ;;  %s1090_s14 = smov %s876_s16 }
 0x126   :  { %12 = sbr.rel (!%p10_p8) target bundleno = 2 (0x2), region = 85 }

</bundles_post_ra>
